<compile_context>
chip_gen: v7x
topology: tpu7x:2x2x1
jax: 0.10.0
libtpu: 0.0.40
codegen_flags: <defaults>
</compile_context>

<pallas_src>
import math
import numpy as np
import jax
import jax.numpy as jnp
from jax.experimental import pallas as pl
from jax.experimental.pallas import tpu as pltpu

SIZE_LIST = [32, 64, 64, 64, 10]
BATCH = 8
BN_EPS = 1e-5
PAD = 128          # lane-dense feature width
N_LAYERS = len(SIZE_LIST) - 1   # 4


def mlp_kernel(x_ref, w_ref, p_ref, o_ref):
    """Whole forward pass in one invocation.

    x_ref : (B, 128)        padded input activations (f32)
    w_ref : (4, 128, 128)   per-layer weights, zero-padded, stored as (in, out)
    p_ref : (8, 128)        rows 0..3 = biases of layers 0..3,
                            rows 4..5 = gammas of BN layers 0..1,
                            rows 6..7 = betas  of BN layers 0..1 (all zero-padded)
    o_ref : (B, 128)        lane-dense output (columns >= 10 are zero)
    """

    def linear(h, l):
        # static slice views into the packed slabs -> zero runtime cost
        w = w_ref[l]                       # (128, 128)
        b = p_ref[l:l + 1, :]              # (1, 128)
        return jnp.dot(h, w, preferred_element_type=jnp.float32) + b

    def batchnorm(h, l):
        # train-mode BatchNorm1d, folded into one fused scale/shift
        g = p_ref[4 + l:5 + l, :]          # (1, 128)
        be = p_ref[6 + l:7 + l, :]         # (1, 128)
        mean = jnp.mean(h, axis=0, keepdims=True)
        var = jnp.mean((h - mean) * (h - mean), axis=0, keepdims=True)
        scale = g * jax.lax.rsqrt(var + BN_EPS)   # rsqrt -> EUP slot (cheap)
        shift = be - mean * scale
        return h * scale + shift

    h = x_ref[...].astype(jnp.float32)

    # block 0: Linear + BN + ReLU
    h = jnp.maximum(batchnorm(linear(h, 0), 0), 0.0)
    # block 1: Linear + BN + ReLU
    h = jnp.maximum(batchnorm(linear(h, 1), 1), 0.0)
    # block 2: Linear + ReLU (no BN since i >= 2)
    h = jnp.maximum(linear(h, 2), 0.0)
    # final Linear
    h = linear(h, 3)

    o_ref[...] = h.astype(o_ref.dtype)


def mlp_forward(x, w_slab, p_slab, out_dim):
    """x: (B, in_dim) f32; slabs from pack_params(); returns (B, out_dim)."""
    B, in_dim = x.shape
    # pad input to lane-dense (B, 128); padded columns hit zero weight rows
    x_pad = jnp.zeros((B, PAD), jnp.float32).at[:, :in_dim].set(x)

    vmem = pl.BlockSpec(memory_space=pltpu.MemorySpace.VMEM)
    out_pad = pl.pallas_call(
        mlp_kernel,
        out_shape=jax.ShapeDtypeStruct((B, PAD), jnp.float32),
        in_specs=[vmem, vmem, vmem],
        out_specs=vmem,
    )(x_pad, w_slab, p_slab)

    return out_pad[:, :out_dim]


def init_params(key, size_list):
    """Deterministic init mirroring PyTorch defaults.

    Linear: W, b ~ U(-1/sqrt(fan_in), 1/sqrt(fan_in)); weight stored transposed (in, out).
    BatchNorm1d: gamma = 1, beta = 0.
    """
    params = []
    n_layers = len(size_list) - 1
    for i in range(n_layers):
        fan_in, fan_out = size_list[i], size_list[i + 1]
        key, kw, kb = jax.random.split(key, 3)
        bound = 1.0 / math.sqrt(fan_in)
        w_t = jax.random.uniform(kw, (fan_in, fan_out), jnp.float32, -bound, bound)
        b = jax.random.uniform(kb, (1, fan_out), jnp.float32, -bound, bound)
        p = {"w": w_t, "b": b}
        # BN only when i < 2 and not on the final layer
        if i < 2 and i < n_layers - 1:
            p["gamma"] = jnp.ones((1, fan_out), jnp.float32)
            p["beta"] = jnp.zeros((1, fan_out), jnp.float32)
        params.append(p)
    return params


def pack_params(params):
    """Pack all layer params into two zero-padded slabs for the kernel."""
    w_slab = jnp.zeros((N_LAYERS, PAD, PAD), jnp.float32)
    p_slab = jnp.zeros((8, PAD), jnp.float32)
    for l, p in enumerate(params):
        fin, fout = p["w"].shape
        w_slab = w_slab.at[l, :fin, :fout].set(p["w"])
        p_slab = p_slab.at[l, :fout].set(p["b"][0])
        if "gamma" in p:
            p_slab = p_slab.at[4 + l, :fout].set(p["gamma"][0])
            p_slab = p_slab.at[6 + l, :fout].set(p["beta"][0])
    return w_slab, p_slab


def reference_forward(x, params):
    """Plain-JAX reference (unpadded) for correctness checking."""
    h = x
    n_layers = len(params)
    for i, p in enumerate(params):
        h = h @ p["w"] + p["b"]
        if i < n_layers - 1:
            if "gamma" in p:
                mean = jnp.mean(h, axis=0, keepdims=True)
                var = jnp.mean((h - mean) ** 2, axis=0, keepdims=True)
                h = (h - mean) / jnp.sqrt(var + BN_EPS) * p["gamma"] + p["beta"]
            h = jnp.maximum(h, 0.0)
    return h


if __name__ == "__main__":
    key = jax.random.PRNGKey(0)
    key, kx = jax.random.split(key)

    x = jax.random.normal(kx, (BATCH, SIZE_LIST[0]), jnp.float32)
    params = init_params(key, SIZE_LIST)
    w_slab, p_slab = pack_params(params)

    out = mlp_forward(x, w_slab, p_slab, SIZE_LIST[-1])
    out = jax.block_until_ready(out)

    ref = reference_forward(x, params)
    np.testing.assert_allclose(np.asarray(out), np.asarray(ref), rtol=1e-5, atol=1e-5)

    print("KERNEL_OK")
</pallas_src>

<mosaic_0001>
module attributes {stable_mosaic.version = 11 : i64} {
  func.func @mlp_kernel(%arg0: memref<8x128xf32, #tpu.memory_space<vmem>>, %arg1: memref<4x128x128xf32, #tpu.memory_space<vmem>>, %arg2: memref<8x128xf32, #tpu.memory_space<vmem>>, %arg3: memref<8x128xf32, #tpu.memory_space<vmem>>) attributes {dimension_semantics = [], scalar_prefetch = 0 : i64, scratch_operands = 0 : i64, tpu.core_type = #tpu.core_type<tc>} {
    %c0 = arith.constant 0 : index
    %c0_0 = arith.constant 0 : index
    %0 = vector.load %arg0[%c0, %c0_0] : memref<8x128xf32, #tpu.memory_space<vmem>>, vector<8x128xf32>
    %c0_1 = arith.constant 0 : index
    %c0_2 = arith.constant 0 : index
    %c0_3 = arith.constant 0 : index
    %1 = vector.load %arg1[%c0_1, %c0_2, %c0_3] : memref<4x128x128xf32, #tpu.memory_space<vmem>>, vector<1x128x128xf32>
    %2 = vector.shape_cast %1 : vector<1x128x128xf32> to vector<128x128xf32>
    %c0_4 = arith.constant 0 : index
    %c0_5 = arith.constant 0 : index
    %3 = vector.load %arg2[%c0_4, %c0_5] : memref<8x128xf32, #tpu.memory_space<vmem>>, vector<1x128xf32>
    %cst = arith.constant dense<0.000000e+00> : vector<8x128xf32>
    %4 = tpu.matmul %0, %2, %cst {dimension_numbers = #tpu.dot_dimension_numbers<[1], [0], [0], [1], [0, 0, 1, 1], [], []>} : vector<8x128xf32>, vector<128x128xf32>, vector<8x128xf32> -> vector<8x128xf32>
    %5 = vector.broadcast %3 : vector<1x128xf32> to vector<8x128xf32>
    %6 = arith.addf %4, %5 : vector<8x128xf32>
    %c4 = arith.constant 4 : index
    %c0_6 = arith.constant 0 : index
    %7 = vector.load %arg2[%c4, %c0_6] : memref<8x128xf32, #tpu.memory_space<vmem>>, vector<1x128xf32>
    %c6 = arith.constant 6 : index
    %c0_7 = arith.constant 0 : index
    %8 = vector.load %arg2[%c6, %c0_7] : memref<8x128xf32, #tpu.memory_space<vmem>>, vector<1x128xf32>
    %cst_8 = arith.constant dense<0.000000e+00> : vector<128xf32>
    %9 = vector.multi_reduction <add>, %6, %cst_8 [0] : vector<8x128xf32> to vector<128xf32>
    %10 = vector.shape_cast %9 : vector<128xf32> to vector<1x128xf32>
    %cst_9 = arith.constant 8.000000e+00 : f32
    %11 = vector.broadcast %cst_9 : f32 to vector<1x128xf32>
    %12 = arith.divf %10, %11 : vector<1x128xf32>
    %13 = vector.broadcast %12 : vector<1x128xf32> to vector<8x128xf32>
    %14 = arith.subf %6, %13 : vector<8x128xf32>
    %15 = vector.broadcast %12 : vector<1x128xf32> to vector<8x128xf32>
    %16 = arith.subf %6, %15 : vector<8x128xf32>
    %17 = arith.mulf %14, %16 : vector<8x128xf32>
    %cst_10 = arith.constant dense<0.000000e+00> : vector<128xf32>
    %18 = vector.multi_reduction <add>, %17, %cst_10 [0] : vector<8x128xf32> to vector<128xf32>
    %19 = vector.shape_cast %18 : vector<128xf32> to vector<1x128xf32>
    %cst_11 = arith.constant 8.000000e+00 : f32
    %20 = vector.broadcast %cst_11 : f32 to vector<1x128xf32>
    %21 = arith.divf %19, %20 : vector<1x128xf32>
    %cst_12 = arith.constant 9.99999974E-6 : f32
    %22 = vector.broadcast %cst_12 : f32 to vector<1x128xf32>
    %23 = arith.addf %21, %22 : vector<1x128xf32>
    %24 = math.rsqrt %23 : vector<1x128xf32>
    %25 = arith.mulf %7, %24 : vector<1x128xf32>
    %26 = arith.mulf %12, %25 : vector<1x128xf32>
    %27 = arith.subf %8, %26 : vector<1x128xf32>
    %28 = vector.broadcast %25 : vector<1x128xf32> to vector<8x128xf32>
    %29 = arith.mulf %6, %28 : vector<8x128xf32>
    %30 = vector.broadcast %27 : vector<1x128xf32> to vector<8x128xf32>
    %31 = arith.addf %29, %30 : vector<8x128xf32>
    %cst_13 = arith.constant 0.000000e+00 : f32
    %32 = vector.broadcast %cst_13 : f32 to vector<8x128xf32>
    %33 = arith.maximumf %31, %32 : vector<8x128xf32>
    %c1 = arith.constant 1 : index
    %c0_14 = arith.constant 0 : index
    %c0_15 = arith.constant 0 : index
    %34 = vector.load %arg1[%c1, %c0_14, %c0_15] : memref<4x128x128xf32, #tpu.memory_space<vmem>>, vector<1x128x128xf32>
    %35 = vector.shape_cast %34 : vector<1x128x128xf32> to vector<128x128xf32>
    %c1_16 = arith.constant 1 : index
    %c0_17 = arith.constant 0 : index
    %36 = vector.load %arg2[%c1_16, %c0_17] : memref<8x128xf32, #tpu.memory_space<vmem>>, vector<1x128xf32>
    %cst_18 = arith.constant dense<0.000000e+00> : vector<8x128xf32>
    %37 = tpu.matmul %33, %35, %cst_18 {dimension_numbers = #tpu.dot_dimension_numbers<[1], [0], [0], [1], [0, 0, 1, 1], [], []>} : vector<8x128xf32>, vector<128x128xf32>, vector<8x128xf32> -> vector<8x128xf32>
    %38 = vector.broadcast %36 : vector<1x128xf32> to vector<8x128xf32>
    %39 = arith.addf %37, %38 : vector<8x128xf32>
    %c5 = arith.constant 5 : index
    %c0_19 = arith.constant 0 : index
    %40 = vector.load %arg2[%c5, %c0_19] : memref<8x128xf32, #tpu.memory_space<vmem>>, vector<1x128xf32>
    %c7 = arith.constant 7 : index
    %c0_20 = arith.constant 0 : index
    %41 = vector.load %arg2[%c7, %c0_20] : memref<8x128xf32, #tpu.memory_space<vmem>>, vector<1x128xf32>
    %cst_21 = arith.constant dense<0.000000e+00> : vector<128xf32>
    %42 = vector.multi_reduction <add>, %39, %cst_21 [0] : vector<8x128xf32> to vector<128xf32>
    %43 = vector.shape_cast %42 : vector<128xf32> to vector<1x128xf32>
    %cst_22 = arith.constant 8.000000e+00 : f32
    %44 = vector.broadcast %cst_22 : f32 to vector<1x128xf32>
    %45 = arith.divf %43, %44 : vector<1x128xf32>
    %46 = vector.broadcast %45 : vector<1x128xf32> to vector<8x128xf32>
    %47 = arith.subf %39, %46 : vector<8x128xf32>
    %48 = vector.broadcast %45 : vector<1x128xf32> to vector<8x128xf32>
    %49 = arith.subf %39, %48 : vector<8x128xf32>
    %50 = arith.mulf %47, %49 : vector<8x128xf32>
    %cst_23 = arith.constant dense<0.000000e+00> : vector<128xf32>
    %51 = vector.multi_reduction <add>, %50, %cst_23 [0] : vector<8x128xf32> to vector<128xf32>
    %52 = vector.shape_cast %51 : vector<128xf32> to vector<1x128xf32>
    %cst_24 = arith.constant 8.000000e+00 : f32
    %53 = vector.broadcast %cst_24 : f32 to vector<1x128xf32>
    %54 = arith.divf %52, %53 : vector<1x128xf32>
    %cst_25 = arith.constant 9.99999974E-6 : f32
    %55 = vector.broadcast %cst_25 : f32 to vector<1x128xf32>
    %56 = arith.addf %54, %55 : vector<1x128xf32>
    %57 = math.rsqrt %56 : vector<1x128xf32>
    %58 = arith.mulf %40, %57 : vector<1x128xf32>
    %59 = arith.mulf %45, %58 : vector<1x128xf32>
    %60 = arith.subf %41, %59 : vector<1x128xf32>
    %61 = vector.broadcast %58 : vector<1x128xf32> to vector<8x128xf32>
    %62 = arith.mulf %39, %61 : vector<8x128xf32>
    %63 = vector.broadcast %60 : vector<1x128xf32> to vector<8x128xf32>
    %64 = arith.addf %62, %63 : vector<8x128xf32>
    %cst_26 = arith.constant 0.000000e+00 : f32
    %65 = vector.broadcast %cst_26 : f32 to vector<8x128xf32>
    %66 = arith.maximumf %64, %65 : vector<8x128xf32>
    %c2 = arith.constant 2 : index
    %c0_27 = arith.constant 0 : index
    %c0_28 = arith.constant 0 : index
    %67 = vector.load %arg1[%c2, %c0_27, %c0_28] : memref<4x128x128xf32, #tpu.memory_space<vmem>>, vector<1x128x128xf32>
    %68 = vector.shape_cast %67 : vector<1x128x128xf32> to vector<128x128xf32>
    %c2_29 = arith.constant 2 : index
    %c0_30 = arith.constant 0 : index
    %69 = vector.load %arg2[%c2_29, %c0_30] : memref<8x128xf32, #tpu.memory_space<vmem>>, vector<1x128xf32>
    %cst_31 = arith.constant dense<0.000000e+00> : vector<8x128xf32>
    %70 = tpu.matmul %66, %68, %cst_31 {dimension_numbers = #tpu.dot_dimension_numbers<[1], [0], [0], [1], [0, 0, 1, 1], [], []>} : vector<8x128xf32>, vector<128x128xf32>, vector<8x128xf32> -> vector<8x128xf32>
    %71 = vector.broadcast %69 : vector<1x128xf32> to vector<8x128xf32>
    %72 = arith.addf %70, %71 : vector<8x128xf32>
    %cst_32 = arith.constant 0.000000e+00 : f32
    %73 = vector.broadcast %cst_32 : f32 to vector<8x128xf32>
    %74 = arith.maximumf %72, %73 : vector<8x128xf32>
    %c3 = arith.constant 3 : index
    %c0_33 = arith.constant 0 : index
    %c0_34 = arith.constant 0 : index
    %75 = vector.load %arg1[%c3, %c0_33, %c0_34] : memref<4x128x128xf32, #tpu.memory_space<vmem>>, vector<1x128x128xf32>
    %76 = vector.shape_cast %75 : vector<1x128x128xf32> to vector<128x128xf32>
    %c3_35 = arith.constant 3 : index
    %c0_36 = arith.constant 0 : index
    %77 = vector.load %arg2[%c3_35, %c0_36] : memref<8x128xf32, #tpu.memory_space<vmem>>, vector<1x128xf32>
    %cst_37 = arith.constant dense<0.000000e+00> : vector<8x128xf32>
    %78 = tpu.matmul %74, %76, %cst_37 {dimension_numbers = #tpu.dot_dimension_numbers<[1], [0], [0], [1], [0, 0, 1, 1], [], []>} : vector<8x128xf32>, vector<128x128xf32>, vector<8x128xf32> -> vector<8x128xf32>
    %79 = vector.broadcast %77 : vector<1x128xf32> to vector<8x128xf32>
    %80 = arith.addf %78, %79 : vector<8x128xf32>
    %c0_38 = arith.constant 0 : index
    %c0_39 = arith.constant 0 : index
    %81 = vector.load %arg3[%c0_38, %c0_39] : memref<8x128xf32, #tpu.memory_space<vmem>>, vector<8x128xf32>
    tpu.vector_store %arg3[%c0_38, %c0_39], %80 {strides = array<i32>} : memref<8x128xf32, #tpu.memory_space<vmem>>, vector<8x128xf32>,
    return
  }
}

</mosaic_0001>

<bundles_post_ra>
// kernel: tpu_custom_call.1
= control target key start
LH: loop header
LB: loop body
LE: loop exit
PB: predicated region body
PF: predicated region fallthrough
CT: control target
= control target key end

     0   :  { %8 = vsyncpa [#allocation3], 0  ;;  %s1045_s0 = inlined_call_operand.hbm [shape: f32[8,128], index: 0, kind: input, shape index: {}]   ;;  %s1046_s1 = inlined_call_operand.hbm [shape: f32[4,128,128], index: 1, kind: input, shape index: {}]   ;;  %s1047_s2 = inlined_call_operand.hbm [shape: f32[8,128], index: 2, kind: input, shape index: {}]   ;;  %s1048_s3 = inlined_call_operand.hbm [shape: f32[8,128], index: 3, kind: output, shape index: {}]  }
   0x1   :  { %9 = vsyncpa [#allocation6], 0 }
   0x2   :  { %10 = vsyncpa [#allocation4], 0  ;;  %s922_s12 = smov [#allocation5]   ;;  %s828_s16 = scalar_lea.hbm %s1046_s1, 8192 }
   0x3   :  { %s26_s13 = sshll.u32 %s922_s12, 4  ;;  %p829_p0 = scmp.ne.s32.totalorder %s1046_s1, %s828_s16  ;;  %s27_s13 = int_to_ptr.vmem [resolvable:$true] %s26_s13 }
   0x4   :  { %p832_p1 = scmp.lt.u32.totalorder %s828_s16, %s1046_s1 }
   0x6   :  { %p834_p2 = pnand %p832_p1, %p829_p0 }
   0x8   :  { %837 = shalt.err (!%p834_p2)
}
   0x9   :  { %s838_s21 = scalar_lea.vmem %s27_s13, 8192  ;;  %p843_p4 = scmp.lt.s32.totalorder %s27_s13, %s27_s13 }
   0xa   :  { %p839_p3 = scmp.ne.s32.totalorder %s27_s13, %s838_s21  ;;  %p844_p5 = scmp.lt.s32.totalorder %s838_s21, %s838_s21 }
   0xc   :  { %p845_p6 = por %p844_p5, %p843_p4 }
   0xe   :  { %p846_p7 = pnand %p845_p6, %p839_p3 }
  0x10   :  { %849 = shalt.err (!%p846_p7)
}
  0x11   :  { %s923_s22 = smov 128   ;;  %s924_s23 = smov 8  }
  0x12   :  { %32 = dma.hbm_to_vmem [thread:$0]  %s1046_s1, 8192, %s27_s13, [#allocation6], %s923_s22, %s923_s22, %s924_s23  }
  0x13   :  { %s925_s26 = smov [#allocation2]   ;;  %s926_s28 = smov [#allocation7]  }
  0x14   :  { %s17_s27 = sshll.u32 %s925_s26, 4  ;;  %s39_s29 = sshll.u32 %s926_s28, 4  ;;  %s18_s27 = int_to_ptr.vmem [resolvable:$true] %s17_s27  ;;  %s40_s29 = int_to_ptr.vmem [resolvable:$true] %s39_s29 }
  0x15   :  { %s850_s5 = scalar_lea.hbm %s1045_s0, 128 }
  0x16   :  { %p851_p8 = scmp.ne.s32.totalorder %s1045_s0, %s850_s5  ;;  %p854_p9 = scmp.lt.u32.totalorder %s850_s5, %s1045_s0 }
  0x18   :  { %p856_p10 = pnand %p854_p9, %p851_p8 }
  0x1a   :  { %859 = shalt.err (!%p856_p10)
}
  0x1b   :  { %s860_s1 = scalar_lea.vmem %s18_s27, 128  ;;  %p865_p12 = scmp.lt.s32.totalorder %s18_s27, %s18_s27 }
  0x1c   :  { %p861_p11 = scmp.ne.s32.totalorder %s18_s27, %s860_s1  ;;  %p866_p13 = scmp.lt.s32.totalorder %s860_s1, %s860_s1 }
  0x1e   :  { %p867_p0 = por %p866_p13, %p865_p12 }
  0x20   :  { %p868_p1 = pnand %p867_p0, %p861_p11 }
  0x22   :  { %871 = shalt.err (!%p868_p1)
}
  0x23   :  { %20 = dma.hbm_to_vmem [thread:$0]  %s1045_s0, 128, %s18_s27, [#allocation3]  }
  0x24   :  { %s872_s14 = scalar_lea.hbm %s1047_s2, 128 }
  0x25   :  { %p873_p2 = scmp.ne.s32.totalorder %s1047_s2, %s872_s14  ;;  %p876_p3 = scmp.lt.u32.totalorder %s872_s14, %s1047_s2 }
  0x27   :  { %p878_p4 = pnand %p876_p3, %p873_p2 }
  0x29   :  { %881 = shalt.err (!%p878_p4)
}
  0x2a   :  { %s882_s19 = scalar_lea.vmem %s40_s29, 128  ;;  %p887_p6 = scmp.lt.s32.totalorder %s40_s29, %s40_s29 }
  0x2b   :  { %p883_p5 = scmp.ne.s32.totalorder %s40_s29, %s882_s19  ;;  %p888_p7 = scmp.lt.s32.totalorder %s882_s19, %s882_s19 }
  0x2d   :  { %p889_p8 = por %p888_p7, %p887_p6 }
  0x2f   :  { %p890_p9 = pnand %p889_p8, %p883_p5 }
  0x31   :  { %893 = shalt.err (!%p890_p9)
}
  0x32   :  { %42 = dma.hbm_to_vmem [thread:$0]  %s1047_s2, 128, %s40_s29, [#allocation6]  }
  0x33   :  { %916 = dma.done.wait [#allocation3], 128  }
  0x34   :  { %917 = vsyncadd [#allocation3], 4294967168 }
  0x35   :  { %918 = dma.done.wait [#allocation6], 8320  }
  0x36   :  { %919 = vsyncadd [#allocation6], 4294958976  ;;  %v927_v0 = vmov 0.0|0.0   ;;  %vm928_vm0 = vmmov 0   ;;  %v929_v1 = vmov 0.0   ;;  %v53_v2 = vld [vmem:[#allocation5] sm:$0xff] }
  0x37   :  { %719 = vmatprep.subr.bf16.mxu0 %v927_v0  ;;  %611 = vmatprep.mubr.msk.f32.mxu0 %vm928_vm0, %v929_v1  ;;  %v54_v3 = vld [vmem:[#allocation5 + $0x8] sm:$0xff]  ;;  %v55_v4 = vld [vmem:[#allocation5 + $0x10] sm:$0xff]  ;;  %v56_v6 = vld [vmem:[#allocation5 + $0x18] sm:$0xff]  ;;  %s930_s2 = smov [#allocation8]  }
  0x38   :  { %743 = vmatprep.subr.bf16.mxu1 %v927_v0  ;;  %646 = vmatprep.mubr.msk.f32.mxu1 %vm928_vm0, %v929_v1  ;;  %v720_v5 = vpack.c.bf16 %v54_v3, %v53_v2  ;;  %v723_v7 = vpack.c.bf16 %v56_v6, %v55_v4  ;;  %v57_v8 = vld [vmem:[#allocation5 + $0x20] sm:$0xff]  ;;  %v58_v9 = vld [vmem:[#allocation5 + $0x28] sm:$0xff]  ;;  %v59_v11 = vld [vmem:[#allocation5 + $0x30] sm:$0xff]  ;;  %s497_s21 = sshll.u32 %s930_s2, 4  ;;  %s498_s21 = int_to_ptr.vmem [resolvable:$true] %s497_s21 }
  0x39   :  { %v726_v10 = vpack.c.bf16 %v58_v9, %v57_v8  ;;  %v60_v12 = vld [vmem:[#allocation5 + $0x38] sm:$0xff]  ;;  %v61_v14 = vld [vmem:[#allocation5 + $0x40] sm:$0xff]  ;;  %v62_v15 = vld [vmem:[#allocation5 + $0x48] sm:$0xff]  ;;  %s894_s22 = scalar_lea.vmem %s498_s21, 128  ;;  %p899_p11 = scmp.lt.s32.totalorder %s498_s21, %s498_s21 }
  0x3a   :  { %721 = vmatpush3.bf16.msra.mxu0 %v720_v5  ;;  %v729_v13 = vpack.c.bf16 %v60_v12, %v59_v11  ;;  %v732_v16 = vpack.c.bf16 %v62_v15, %v61_v14  ;;  %v63_v17 = vld [vmem:[#allocation5 + $0x50] sm:$0xff]  ;;  %v64_v18 = vld [vmem:[#allocation5 + $0x58] sm:$0xff]  ;;  %v65_v20 = vld [vmem:[#allocation5 + $0x60] sm:$0xff]  ;;  %p895_p10 = scmp.ne.s32.totalorder %s498_s21, %s894_s22  ;;  %p900_p12 = scmp.lt.s32.totalorder %s894_s22, %s894_s22 }
  0x3b   :  { %722 = vmatprep.subr.bf16.mxu0 %v927_v0  ;;  %v735_v19 = vpack.c.bf16 %v64_v18, %v63_v17  ;;  %v66_v21 = vld [vmem:[#allocation5 + $0x68] sm:$0xff]  ;;  %v67_v23 = vld [vmem:[#allocation5 + $0x70] sm:$0xff]  ;;  %v68_v24 = vld [vmem:[#allocation5 + $0x78] sm:$0xff] }
  0x3c   :  { %v738_v22 = vpack.c.bf16 %v66_v21, %v65_v20  ;;  %v741_v25 = vpack.c.bf16 %v68_v24, %v67_v23  ;;  %v52_v26 = vld [vmem:[#allocation2] sm:$0xff]  ;;  %v180_v27 = vld [vmem:[#allocation5 + $0x80] sm:$0xff]  ;;  %v181_v28 = vld [vmem:[#allocation5 + $0x88] sm:$0xff]  ;;  %p901_p13 = por %p900_p12, %p899_p11 }
  0x3d   :  { %v744_v29 = vpack.c.bf16 %v181_v28, %v180_v27  ;;  %v182_v30 = vld [vmem:[#allocation5 + $0x90] sm:$0xff]  ;;  %v183_v31 = vld [vmem:[#allocation5 + $0x98] sm:$0xff]  ;;  %v184_v33 = vld [vmem:[#allocation5 + $0xa0] sm:$0xff] }
  0x3e   :  { %724 = vmatpush3.bf16.msra.mxu0 %v723_v7  ;;  %v747_v32 = vpack.c.bf16 %v183_v31, %v182_v30  ;;  %v185_v34 = vld [vmem:[#allocation5 + $0xa8] sm:$0xff]  ;;  %v186_v36 = vld [vmem:[#allocation5 + $0xb0] sm:$0xff]  ;;  %v187_v37 = vld [vmem:[#allocation5 + $0xb8] sm:$0xff]  ;;  %p902_p0 = pnand %p901_p13, %p895_p10 }
  0x3f   :  { %725 = vmatprep.subr.bf16.mxu0 %v927_v0  ;;  %745 = vmatpush3.bf16.msra.mxu1 %v744_v29  ;;  %v750_v35 = vpack.c.bf16 %v185_v34, %v184_v33  ;;  %v753_v38 = vpack.c.bf16 %v187_v37, %v186_v36  ;;  %v188_v39 = vld [vmem:[#allocation5 + $0xc0] sm:$0xff]  ;;  %v189_v40 = vld [vmem:[#allocation5 + $0xc8] sm:$0xff]  ;;  %v190_v42 = vld [vmem:[#allocation5 + $0xd0] sm:$0xff] }
  0x40   :  { %746 = vmatprep.subr.bf16.mxu1 %v927_v0  ;;  %v756_v41 = vpack.c.bf16 %v189_v40, %v188_v39  ;;  %v191_v43 = vld [vmem:[#allocation5 + $0xd8] sm:$0xff]  ;;  %v192_v45 = vld [vmem:[#allocation5 + $0xe0] sm:$0xff]  ;;  %v193_v46 = vld [vmem:[#allocation5 + $0xe8] sm:$0xff] }
  0x41   :  { %v759_v44 = vpack.c.bf16 %v191_v43, %v190_v42  ;;  %v762_v47 = vpack.c.bf16 %v193_v46, %v192_v45  ;;  %v194_v48 = vld [vmem:[#allocation5 + $0xf0] sm:$0xff]  ;;  %v195_v49 = vld [vmem:[#allocation5 + $0xf8] sm:$0xff]  ;;  %v507_v51 = vld [vmem:[#allocation7] ss:$0 sm:$0xff] }
  0x42   :  { %727 = vmatpush3.bf16.msra.mxu0 %v726_v10  ;;  %v765_v50 = vpack.c.bf16 %v195_v49, %v194_v48  ;;  %v168_v10 = vlaneseq  ;;  %v144_v12 = vld [vmem:[#allocation7 + $0x4] sm:$0x1]  ;;  %v308_v27 = vld [vmem:[#allocation5 + $0x110] sm:$0xff]  ;;  %v309_v28 = vld [vmem:[#allocation5 + $0x118] sm:$0xff] }
  0x43   :  { %728 = vmatprep.subr.bf16.mxu0 %v927_v0  ;;  %748 = vmatpush3.bf16.msra.mxu1 %v747_v32  ;;  %v306_v24 = vld [vmem:[#allocation5 + $0x100] sm:$0xff]  ;;  %v771_v29 = vpack.c.bf16 %v309_v28, %v308_v27  ;;  %v311_v31 = vld [vmem:[#allocation5 + $0x128] sm:$0xff]  ;;  %v312_v33 = vld [vmem:[#allocation5 + $0x130] sm:$0xff] }
  0x44   :  { %749 = vmatprep.subr.bf16.mxu1 %v927_v0  ;;  %v169_v11 = vshrl.u32 %v168_v10, 7  ;;  %v310_v30 = vld [vmem:[#allocation5 + $0x120] sm:$0xff]  ;;  %v315_v36 = vld [vmem:[#allocation5 + $0x148] sm:$0xff]  ;;  %v317_v39 = vld [vmem:[#allocation5 + $0x158] sm:$0xff] }
  0x45   :  { %v774_v32 = vpack.c.bf16 %v311_v31, %v310_v30  ;;  %v319_v42 = vld [vmem:[#allocation5 + $0x168] sm:$0xff]  ;;  %v321_v45 = vld [vmem:[#allocation5 + $0x178] sm:$0xff]  ;;  %v401_v49 = vld [vmem:[#allocation5 + $0x190] sm:$0xff] }
  0x46   :  { %730 = vmatpush3.bf16.msra.mxu0 %v729_v13  ;;  %v1011_v13 = vsub.s32 0, %v169_v11  ;;  %v400_v48 = vld [vmem:[#allocation5 + $0x188] sm:$0xff]  ;;  %v271_v27 = vld [vmem:[#allocation7 + $0x5] sm:$0x1]  ;;  %v272_v30 = vld [vmem:[#allocation7 + $0x7] sm:$0x1] }
  0x47   :  { %731 = vmatprep.subr.bf16.mxu0 %v927_v0  ;;  %751 = vmatpush3.bf16.msra.mxu1 %v750_v35  ;;  %v314_v35 = vld [vmem:[#allocation5 + $0x140] sm:$0xff] }
  0x48   :  { %752 = vmatprep.subr.bf16.mxu1 %v927_v0  ;;  %v780_v37 = vpack.c.bf16 %v315_v36, %v314_v35 }
  0x4a   :  { %733 = vmatpush3.bf16.msra.mxu0 %v732_v16  ;;  %v145_v16 = vld [vmem:[#allocation7 + $0x6] sm:$0x1] }
  0x4b   :  { %734 = vmatprep.subr.bf16.mxu0 %v927_v0  ;;  %754 = vmatpush3.bf16.msra.mxu1 %v753_v38  ;;  %v316_v38 = vld [vmem:[#allocation5 + $0x150] sm:$0xff] }
  0x4c   :  { %755 = vmatprep.subr.bf16.mxu1 %v927_v0  ;;  %v783_v40 = vpack.c.bf16 %v317_v39, %v316_v38  ;;  %v414_v38 = vld [vmem:[#allocation5 + $0x1f8] sm:$0xff] }
  0x4e   :  { %736 = vmatpush3.bf16.msra.mxu0 %v735_v19 }
  0x4f   :  { %737 = vmatprep.subr.bf16.mxu0 %v927_v0  ;;  %757 = vmatpush3.bf16.msra.mxu1 %v756_v41  ;;  %v318_v41 = vld [vmem:[#allocation5 + $0x160] sm:$0xff] }
  0x50   :  { %758 = vmatprep.subr.bf16.mxu1 %v927_v0  ;;  %v786_v43 = vpack.c.bf16 %v319_v42, %v318_v41 }
  0x52   :  { %739 = vmatpush3.bf16.msra.mxu0 %v738_v22 }
  0x53   :  { %740 = vmatprep.subr.bf16.mxu0 %v927_v0  ;;  %760 = vmatpush3.bf16.msra.mxu1 %v759_v44  ;;  %v320_v44 = vld [vmem:[#allocation5 + $0x170] sm:$0xff] }
  0x54   :  { %761 = vmatprep.subr.bf16.mxu1 %v927_v0  ;;  %v789_v46 = vpack.c.bf16 %v321_v45, %v320_v44  ;;  %v510_v45 = vld [vmem:[#allocation7 + $0x3] ss:$0 sm:$0xff] }
  0x56   :  { %742 = vmatpush3.bf16.msra.mxu0 %v741_v25  ;;  %v307_v25 = vld [vmem:[#allocation5 + $0x108] sm:$0xff] }
  0x57   :  { %767 = vmatprep.subr.bf16.mxu0 %v927_v0  ;;  %763 = vmatpush3.bf16.msra.mxu1 %v762_v47  ;;  %v399_v47 = vld [vmem:[#allocation5 + $0x180] sm:$0xff] }
  0x58   :  { %764 = vmatprep.subr.bf16.mxu1 %v927_v0 }
  0x59   :  { %612 = vmatmul.mubr.f32.vlgmr.msra.gmra.mrb[0].mxu0 %v52_v26  ;;  %v768_v26 = vpack.c.bf16 %v307_v25, %v306_v24 }
  0x5a   :  { %681 = vmatprep.mubr.msk.f32.mxu0 %vm928_vm0, %v929_v1 }
  0x5b   :  { %766 = vmatpush3.bf16.msra.mxu1 %v765_v50  ;;  %769 = vmatpush3.bf16.msra.mxu0 %v768_v26  ;;  %v792_v50 = vpack.c.bf16 %v400_v48, %v399_v47 }
  0x5c   :  { %791 = vmatprep.subr.bf16.mxu1 %v927_v0  ;;  %770 = vmatprep.subr.bf16.mxu0 %v927_v0 }
  0x5f   :  { %772 = vmatpush3.bf16.msra.mxu0 %v771_v29 }
  0x60   :  { %773 = vmatprep.subr.bf16.mxu0 %v927_v0 }
  0x63   :  { %775 = vmatpush3.bf16.msra.mxu0 %v774_v32 }
  0x64   :  { %776 = vmatprep.subr.bf16.mxu0 %v927_v0 }
 0x12c   :  { %v140_v52 = vpop.f32.mrb[0].mxu0 }
 0x12d   :  { %v141_v53 = vadd.f32 %v507_v51, %v140_v52  ;;  %v613_v54 = vpop.f32.mrb[1].mxu0  ;;  %v402_v51 = vld [vmem:[#allocation5 + $0x198] sm:$0xff] }
 0x12e   :  { %v795_v52 = vpack.c.bf16 %v402_v51, %v401_v49  ;;  %v404_v54 = vld [vmem:[#allocation5 + $0x1a8] sm:$0xff] }
 0x12f   :  { %v146_v55 = vrot.slane %v141_v53, 4 }
 0x131   :  { %v147_v56 = vadd.f32 %v146_v55, %v141_v53 }
 0x133   :  { %v148_v57 = vrot.slane %v147_v56, 2 }
 0x135   :  { %v149_v58 = vadd.f32 %v148_v57, %v147_v56  ;;  %v405_v56 = vld [vmem:[#allocation5 + $0x1b0] sm:$0xff]  ;;  %v406_v57 = vld [vmem:[#allocation5 + $0x1b8] sm:$0xff] }
 0x137   :  { %v150_v59 = vrot.slane %v149_v58, 1 }
 0x139   :  { %v151_v60 = vadd.f32 %v150_v59, %v149_v58  ;;  %v801_v58 = vpack.c.bf16 %v406_v57, %v405_v56  ;;  %v407_v59 = vld [vmem:[#allocation5 + $0x1c0] sm:$0xff] }
 0x13b   :  { %v153_v61 = vmul.f32 0.125, %v151_v60  ;;  %v408_v60 = vld [vmem:[#allocation5 + $0x1c8] sm:$0xff] }
 0x13d   :  { %v154_v62 = vsub.f32 %v141_v53, %v153_v61 }
 0x13f   :  { %v155_v63 = vmul.f32 %v154_v62, %v154_v62  ;;  %v409_v62 = vld [vmem:[#allocation5 + $0x1d0] sm:$0xff] }
 0x141   :  { %v156_v2 = vrot.slane %v155_v63, 4 }
 0x143   :  { %v157_v3 = vadd.f32 %v156_v2, %v155_v63  ;;  %v410_v63 = vld [vmem:[#allocation5 + $0x1d8] sm:$0xff] }
 0x144   :  { %v807_v2 = vpack.c.bf16 %v410_v63, %v409_v62 }
 0x145   :  { %v158_v4 = vrot.slane %v157_v3, 2 }
 0x147   :  { %v159_v5 = vadd.f32 %v158_v4, %v157_v3  ;;  %v411_v3 = vld [vmem:[#allocation5 + $0x1e0] sm:$0xff]  ;;  %v412_v4 = vld [vmem:[#allocation5 + $0x1e8] sm:$0xff] }
 0x149   :  { %v160_v6 = vrot.slane %v159_v5, 1 }
 0x14b   :  { %v161_v7 = vadd.f32 %v160_v6, %v159_v5  ;;  %v810_v5 = vpack.c.bf16 %v412_v4, %v411_v3  ;;  %v508_v6 = vld [vmem:[#allocation7 + $0x1] ss:$0 sm:$0xff] }
 0x14d   :  { %v162_v8 = vmul.f32 0.125, %v161_v7 }
 0x14f   :  { %v163_v9 = vadd.f32 1e-05, %v162_v8 }
 0x151   :  { %824 = vrsqrt.f32 %v163_v9 }
 0x15b   :  { %v825_v14 = vpop.eup %824 }
 0x15c   :  { %v165_v15 = vmul.f32 %v825_v14, %v144_v12 }
 0x15e   :  { %v166_v17 = vmul.f32 %v165_v15, %v153_v61  ;;  %v171_v18 = vrot.slane %v165_v15, %v1011_v13  ;;  %v804_v61 = vpack.c.bf16 %v408_v60, %v407_v59 }
 0x160   :  { %v167_v19 = vsub.f32 %v145_v16, %v166_v17  ;;  %v172_v20 = vmul.f32 %v171_v18, %v141_v53  ;;  %v403_v53 = vld [vmem:[#allocation5 + $0x1a0] sm:$0xff] }
 0x161   :  { %v798_v55 = vpack.c.bf16 %v404_v54, %v403_v53 }
 0x162   :  { %v176_v21 = vrot.slane %v167_v19, %v1011_v13 }
 0x164   :  { %v177_v22 = vadd.f32 %v176_v21, %v172_v20 }
 0x166   :  { %v178_v23 = vmax.f32 %v177_v22, 0.0 }
 0x168   :  { %647 = vmatmul.mubr.f32.vlgmr.msra.gmra.mrb[0].mxu1 %v178_v23 }
 0x169   :  { %716 = vmatprep.mubr.msk.f32.mxu1 %vm928_vm0, %v929_v1  ;;  %v313_v1 = vld [vmem:[#allocation5 + $0x138] sm:$0xff]  ;;  %793 = vmatpush3.bf16.msra.mxu1 %v792_v50 }
 0x16a   :  { %v777_v34 = vpack.c.bf16 %v313_v1, %v312_v33  ;;  %794 = vmatprep.subr.bf16.mxu1 %v927_v0 }
 0x16c   :  { %778 = vmatpush3.bf16.msra.mxu0 %v777_v34 }
 0x16d   :  { %779 = vmatprep.subr.bf16.mxu0 %v927_v0  ;;  %796 = vmatpush3.bf16.msra.mxu1 %v795_v52 }
 0x16e   :  { %797 = vmatprep.subr.bf16.mxu1 %v927_v0 }
 0x170   :  { %781 = vmatpush3.bf16.msra.mxu0 %v780_v37  ;;  %v413_v37 = vld [vmem:[#allocation5 + $0x1f0] sm:$0xff] }
 0x171   :  { %782 = vmatprep.subr.bf16.mxu0 %v927_v0  ;;  %799 = vmatpush3.bf16.msra.mxu1 %v798_v55  ;;  %v813_v39 = vpack.c.bf16 %v414_v38, %v413_v37 }
 0x172   :  { %800 = vmatprep.subr.bf16.mxu1 %v927_v0 }
 0x174   :  { %784 = vmatpush3.bf16.msra.mxu0 %v783_v40  ;;  %v509_v40 = vld [vmem:[#allocation7 + $0x2] ss:$0 sm:$0xff] }
 0x175   :  { %785 = vmatprep.subr.bf16.mxu0 %v927_v0  ;;  %802 = vmatpush3.bf16.msra.mxu1 %v801_v58 }
 0x176   :  { %803 = vmatprep.subr.bf16.mxu1 %v927_v0 }
 0x178   :  { %787 = vmatpush3.bf16.msra.mxu0 %v786_v43 }
 0x179   :  { %788 = vmatprep.subr.bf16.mxu0 %v927_v0  ;;  %805 = vmatpush3.bf16.msra.mxu1 %v804_v61 }
 0x17a   :  { %806 = vmatprep.subr.bf16.mxu1 %v927_v0 }
 0x17c   :  { %790 = vmatpush3.bf16.msra.mxu0 %v789_v46 }
 0x17d   :  { %808 = vmatpush3.bf16.msra.mxu1 %v807_v2 }
 0x17e   :  { %809 = vmatprep.subr.bf16.mxu1 %v927_v0 }
 0x181   :  { %811 = vmatpush3.bf16.msra.mxu1 %v810_v5 }
 0x182   :  { %812 = vmatprep.subr.bf16.mxu1 %v927_v0 }
 0x185   :  { %814 = vmatpush3.bf16.msra.mxu1 %v813_v39 }
 0x23b   :  { %v267_v7 = vpop.f32.mrb[0].mxu1 }
 0x23c   :  { %v268_v8 = vadd.f32 %v508_v6, %v267_v7  ;;  %v648_v9 = vpop.f32.mrb[1].mxu1 }
 0x23e   :  { %v273_v10 = vrot.slane %v268_v8, 4 }
 0x240   :  { %v274_v11 = vadd.f32 %v273_v10, %v268_v8 }
 0x242   :  { %v275_v12 = vrot.slane %v274_v11, 2 }
 0x244   :  { %v276_v14 = vadd.f32 %v275_v12, %v274_v11 }
 0x246   :  { %v277_v15 = vrot.slane %v276_v14, 1 }
 0x248   :  { %v278_v16 = vadd.f32 %v277_v15, %v276_v14 }
 0x24a   :  { %v279_v17 = vmul.f32 0.125, %v278_v16 }
 0x24c   :  { %v280_v18 = vsub.f32 %v268_v8, %v279_v17 }
 0x24e   :  { %v281_v19 = vmul.f32 %v280_v18, %v280_v18 }
 0x250   :  { %v282_v20 = vrot.slane %v281_v19, 4 }
 0x252   :  { %v283_v21 = vadd.f32 %v282_v20, %v281_v19 }
 0x254   :  { %v284_v22 = vrot.slane %v283_v21, 2 }
 0x256   :  { %v285_v23 = vadd.f32 %v284_v22, %v283_v21 }
 0x258   :  { %v286_v24 = vrot.slane %v285_v23, 1 }
 0x25a   :  { %v287_v25 = vadd.f32 %v286_v24, %v285_v23 }
 0x25c   :  { %v288_v0 = vmul.f32 0.125, %v287_v25 }
 0x25e   :  { %v289_v26 = vadd.f32 1e-05, %v288_v0 }
 0x260   :  { %826 = vrsqrt.f32 %v289_v26 }
 0x26a   :  { %v827_v28 = vpop.eup %826 }
 0x26b   :  { %v291_v29 = vmul.f32 %v827_v28, %v271_v27 }
 0x26d   :  { %v292_v31 = vmul.f32 %v291_v29, %v279_v17  ;;  %v297_v32 = vrot.slane %v291_v29, %v1011_v13 }
 0x26f   :  { %v293_v33 = vsub.f32 %v272_v30, %v292_v31  ;;  %v298_v1 = vmul.f32 %v297_v32, %v268_v8 }
 0x271   :  { %v302_v34 = vrot.slane %v293_v33, %v1011_v13 }
 0x273   :  { %v303_v35 = vadd.f32 %v302_v34, %v298_v1 }
 0x275   :  { %v304_v36 = vmax.f32 %v303_v35, 0.0 }
 0x277   :  { %682 = vmatmul.mubr.f32.vlgmr.msra.gmra.mrb[2].mxu0 %v304_v36 }
 0x34a   :  { %v393_v41 = vpop.f32.mrb[2].mxu0 }
 0x34b   :  { %v394_v42 = vadd.f32 %v509_v40, %v393_v41  ;;  %v683_v43 = vpop.f32.mrb[3].mxu0 }
 0x34d   :  { %v397_v44 = vmax.f32 %v394_v42, 0.0 }
 0x34f   :  { %717 = vmatmul.mubr.f32.vlgmr.msra.gmra.mrb[2].mxu1 %v397_v44 }
 0x422   :  { %v486_v46 = vpop.f32.mrb[2].mxu1 }
 0x423   :  { %v487_v47 = vadd.f32 %v510_v45, %v486_v46  ;;  %v718_v48 = vpop.f32.mrb[3].mxu1 }
 0x425   :  { %490 = vst [vmem:[#allocation8] sm:$0xff] %v487_v47 }
 0x426   :  { %905 = shalt.err (!%p902_p0)
}
 0x427   :  { %s906_s25 = scalar_lea.hbm %s1048_s3, 128 }
 0x428   :  { %p907_p1 = scmp.ne.s32.totalorder %s1048_s3, %s906_s25  ;;  %p910_p2 = scmp.lt.u32.totalorder %s906_s25, %s1048_s3 }
 0x42a   :  { %p912_p3 = pnand %p910_p2, %p907_p1 }
 0x42c   :  { %915 = shalt.err (!%p912_p3)
}
 0x42d   :  { %500 = dma.vmem_to_hbm [thread:$0]  %s498_s21, 128, %s1048_s3, [#allocation4]  }
 0x42e   :  { %920 = dma.done.wait [#allocation4], 128  }
 0x42f   :  { %921 = vsyncadd [#allocation4], 4294967168 }
 0x430   :  { %504 = vsyncpa [#allocation3], 1 }
 0x431   :  { %505 = vsyncpa [#allocation6], 1 }
 0x432   :  { %506 = vsyncpa [#allocation4], 1 }

</bundles_post_ra>
